<compile_context>
chip_gen: v6e
topology: v6e:2x2x1
jax: 0.10.0
libtpu: 0.0.40
codegen_flags: <defaults>
</compile_context>

<pallas_src>
import jax
import jax.numpy as jnp
from jax.experimental import pallas as pl
from jax.experimental.pallas import tpu as pltpu

_LANE = 128          # lane padding target for feature / internal output dims
_TB_MAX = 2048       # max batch-tile rows (multiple of 8 and 128)
_SPLIT_B = 256       # batch size above which we force >= 2 parallel grid steps


def _round_up(x, m):
    return (x + m - 1) // m * m


def _cdiv(a, b):
    return -(-a // b)


def _choose_tiling(B):
    """Balanced batch tiling: TB multiple of 8, bounded padding, >=2 (even)
    parallel tiles for large B so both v7x TensorCores get work."""
    b8 = _round_up(B, 8)
    n_tiles = _cdiv(b8, _TB_MAX)
    if b8 >= _SPLIT_B:
        n_tiles = max(n_tiles, 2)
        if n_tiles % 2:
            n_tiles += 1
    tb = _round_up(_cdiv(b8, n_tiles), 8)
    return tb, n_tiles * tb                     # (TB, B_pad)


def _q0_kernel(x_ref, w1_ref, b1_ref,
               wr1_ref, br1_ref, wr2_ref, br2_ref,
               wo_ref, bo_ref, q_ref):
    x = x_ref[...]                              # (TB, n_input) f32
    tb, n_in = x.shape
    f_pad = w1_ref.shape[1]

    # features1 = relu(h1(x)). n_input is tiny (e.g. 4): the contraction depth
    # would waste the MXU, so do it as n_input broadcast FMAs on the VPU.
    if n_in <= 16:
        w1 = w1_ref[...]
        f1 = jnp.broadcast_to(b1_ref[...], (tb, f_pad))
        for k in range(n_in):                   # static unroll (tiny)
            f1 = f1 + x[:, k:k + 1] * w1[k:k + 1, :]
    else:
        f1 = jnp.dot(x, w1_ref[...], preferred_element_type=jnp.float32) + b1_ref[...]
    f1 = jnp.maximum(f1, 0.0)

    # ResidualBlock: relu( lin2(relu(lin1(f1))) + f1 )   (MXU, f32 accumulation)
    h = jnp.dot(f1, wr1_ref[...], preferred_element_type=jnp.float32) + br1_ref[...]
    h = jnp.maximum(h, 0.0)
    h = jnp.dot(h, wr2_ref[...], preferred_element_type=jnp.float32) + br2_ref[...]
    f2 = jnp.maximum(h + f1, 0.0)

    # LinearOutput on the lane-dense padded weight, then store only the true
    # n_output columns (output block last dim equals the full array dim).
    q = jnp.dot(f2, wo_ref[...], preferred_element_type=jnp.float32) + bo_ref[...]
    q_ref[...] = q[:, :q_ref.shape[1]].astype(q_ref.dtype)


def q0_forward(state, params, n_output, action=None):
    """state: (B, 1, n_input) or (B, n_input). Returns q (B, n_output) or q_acted."""
    x = jnp.squeeze(state, axis=1) if state.ndim == 3 else state
    x = x.astype(jnp.float32)
    B, n_input = x.shape

    F_pad = params["w1"].shape[1]    # padded feature width  (multiple of 128)
    N_pad = params["wo"].shape[1]    # padded output width   (multiple of 128)

    TB, B_pad = _choose_tiling(B)
    if B_pad != B:
        x = jnp.pad(x, ((0, B_pad - B), (0, 0)))

    grid = (B_pad // TB,)

    # Weights/biases: same block every grid step -> VMEM-resident.
    wspec = lambda shp: pl.BlockSpec(shp, lambda i: (0, 0))

    flops = 2 * B_pad * (n_input * F_pad + 2 * F_pad * F_pad + F_pad * N_pad)
    bytes_accessed = 4 * (B_pad * (n_input + n_output)
                          + n_input * F_pad + 2 * F_pad * F_pad + F_pad * N_pad
                          + 3 * F_pad + N_pad)

    q = pl.pallas_call(
        _q0_kernel,
        out_shape=jax.ShapeDtypeStruct((B_pad, n_output), jnp.float32),
        grid=grid,
        in_specs=[
            pl.BlockSpec((TB, n_input), lambda i: (i, 0)),      # x tile
            wspec((n_input, F_pad)), wspec((1, F_pad)),          # h1
            wspec((F_pad, F_pad)),   wspec((1, F_pad)),          # res lin1
            wspec((F_pad, F_pad)),   wspec((1, F_pad)),          # res lin2
            wspec((F_pad, N_pad)),   wspec((1, N_pad)),          # out
        ],
        out_specs=pl.BlockSpec((TB, n_output), lambda i: (i, 0)),
        compiler_params=pltpu.CompilerParams(
            dimension_semantics=("parallel",),
            vmem_limit_bytes=32 * 1024 * 1024),
        cost_estimate=pl.CostEstimate(
            flops=flops, transcendentals=0, bytes_accessed=bytes_accessed),
    )(x,
      params["w1"], params["b1"],
      params["wr1"], params["br1"],
      params["wr2"], params["br2"],
      params["wo"], params["bo"])

    if B_pad != B:
        q = q[:B]

    if action is None:
        return q
    # q.gather(1, action) then squeeze (all size-1 dims, like torch.squeeze).
    action = action.astype(jnp.int32)
    q_acted = jnp.take_along_axis(q, action, axis=1)
    return jnp.squeeze(q_acted)


def _xavier_uniform(key, fan_in, fan_out, gain=1.0):
    limit = gain * jnp.sqrt(6.0 / (fan_in + fan_out))
    return jax.random.uniform(key, (fan_in, fan_out), jnp.float32, -limit, limit)


def _pad2(a, rows, cols):
    return jnp.pad(a, ((0, rows - a.shape[0]), (0, cols - a.shape[1])))


def init_params(key, n_input, n_features, n_output):
    """Weights stored (in, out) and zero-padded to lane-dense (multiple-of-128) widths."""
    relu_gain = jnp.sqrt(2.0)  # nn.init.calculate_gain('relu')
    F_pad = _round_up(n_features, _LANE)
    N_pad = _round_up(n_output, _LANE)
    k = jax.random.split(key, 4)
    # Xavier limits use the *true* fan-in/out; padding is zeros so numerics match.
    w1 = _xavier_uniform(k[0], n_input, n_features, relu_gain)
    wr1 = _xavier_uniform(k[1], n_features, n_features, relu_gain)
    wr2 = _xavier_uniform(k[2], n_features, n_features, relu_gain)
    wo = _xavier_uniform(k[3], n_features, n_output, 1.0)
    return {
        "w1":  _pad2(w1, n_input, F_pad),
        "b1":  jnp.zeros((1, F_pad), jnp.float32),
        "wr1": _pad2(wr1, F_pad, F_pad),
        "br1": jnp.zeros((1, F_pad), jnp.float32),
        "wr2": _pad2(wr2, F_pad, F_pad),
        "br2": jnp.zeros((1, F_pad), jnp.float32),
        "wo":  _pad2(wo, F_pad, N_pad),
        "bo":  jnp.zeros((1, N_pad), jnp.float32),
    }


def _q0_reference(x, params, n_output):
    """Plain-JAX reference on the padded params (for correctness check)."""
    x = x.astype(jnp.float32)
    f1 = jnp.maximum(x @ params["w1"] + params["b1"], 0.0)
    h = jnp.maximum(f1 @ params["wr1"] + params["br1"], 0.0)
    h = h @ params["wr2"] + params["br2"]
    f2 = jnp.maximum(h + f1, 0.0)
    q = f2 @ params["wo"] + params["bo"]
    return q[:, :n_output]


if __name__ == "__main__":
    key = jax.random.PRNGKey(0)
    k_state, k_act, k_param, k_state2 = jax.random.split(key, 4)

    B, n_input, n_features, n_output = 8, 4, 32, 5
    state = jax.random.normal(k_state, (B, 1, n_input), jnp.float32)
    action = jax.random.randint(k_act, (B, 1), 0, n_output)

    params = init_params(k_param, n_input, n_features, n_output)

    q = q0_forward(state, params, n_output)                       # (B, n_output)
    q_acted = q0_forward(state, params, n_output, action=action)  # (B,)
    jax.block_until_ready((q, q_acted))

    assert q.shape == (B, n_output) and q_acted.shape == (B,)
    q_ref = _q0_reference(jnp.squeeze(state, axis=1), params, n_output)
    assert jnp.allclose(q, q_ref, rtol=1e-5, atol=1e-5)
    assert jnp.allclose(
        q_acted, jnp.squeeze(jnp.take_along_axis(q_ref, action, axis=1)),
        rtol=1e-5, atol=1e-5)

    # Exercise the multi-tile path (2 "parallel" grid steps + batch padding rows).
    B2 = 260
    state2 = jax.random.normal(k_state2, (B2, 1, n_input), jnp.float32)
    q2 = q0_forward(state2, params, n_output)
    jax.block_until_ready(q2)
    q2_ref = _q0_reference(jnp.squeeze(state2, axis=1), params, n_output)
    assert q2.shape == (B2, n_output)
    assert jnp.allclose(q2, q2_ref, rtol=1e-5, atol=1e-5)

    print("KERNEL_OK")
</pallas_src>

<mosaic_0001>
module attributes {stable_mosaic.version = 11 : i64} {
  func.func @_q0_kernel(%arg0: i32, %arg1: memref<8x4xf32, #tpu.memory_space<vmem>>, %arg2: memref<4x128xf32, #tpu.memory_space<vmem>>, %arg3: memref<1x128xf32, #tpu.memory_space<vmem>>, %arg4: memref<128x128xf32, #tpu.memory_space<vmem>>, %arg5: memref<1x128xf32, #tpu.memory_space<vmem>>, %arg6: memref<128x128xf32, #tpu.memory_space<vmem>>, %arg7: memref<1x128xf32, #tpu.memory_space<vmem>>, %arg8: memref<128x128xf32, #tpu.memory_space<vmem>>, %arg9: memref<1x128xf32, #tpu.memory_space<vmem>>, %arg10: memref<8x5xf32, #tpu.memory_space<vmem>>) attributes {dimension_semantics = [#tpu.dimension_semantics<parallel>], iteration_bounds = array<i64: 1>, scalar_prefetch = 0 : i64, scratch_operands = 0 : i64, tpu.core_type = #tpu.core_type<tc>, window_params = [{transform_indices = @transform_0, window_bounds = array<i64: 8, 4>}, {pipeline_mode = #tpu.pipeline_mode<synchronous>, transform_indices = @transform_1, window_bounds = array<i64: 4, 128>}, {pipeline_mode = #tpu.pipeline_mode<synchronous>, transform_indices = @transform_2, window_bounds = array<i64: 1, 128>}, {pipeline_mode = #tpu.pipeline_mode<synchronous>, transform_indices = @transform_3, window_bounds = array<i64: 128, 128>}, {pipeline_mode = #tpu.pipeline_mode<synchronous>, transform_indices = @transform_4, window_bounds = array<i64: 1, 128>}, {pipeline_mode = #tpu.pipeline_mode<synchronous>, transform_indices = @transform_5, window_bounds = array<i64: 128, 128>}, {pipeline_mode = #tpu.pipeline_mode<synchronous>, transform_indices = @transform_6, window_bounds = array<i64: 1, 128>}, {pipeline_mode = #tpu.pipeline_mode<synchronous>, transform_indices = @transform_7, window_bounds = array<i64: 128, 128>}, {pipeline_mode = #tpu.pipeline_mode<synchronous>, transform_indices = @transform_8, window_bounds = array<i64: 1, 128>}, {transform_indices = @transform_9, window_bounds = array<i64: 8, 5>}]} {
    %c0 = arith.constant 0 : index
    %c0_0 = arith.constant 0 : index
    %0 = vector.load %arg1[%c0, %c0_0] : memref<8x4xf32, #tpu.memory_space<vmem>>, vector<8x4xf32>
    %c0_1 = arith.constant 0 : index
    %c0_2 = arith.constant 0 : index
    %1 = vector.load %arg2[%c0_1, %c0_2] : memref<4x128xf32, #tpu.memory_space<vmem>>, vector<4x128xf32>
    %c0_3 = arith.constant 0 : index
    %c0_4 = arith.constant 0 : index
    %2 = vector.load %arg3[%c0_3, %c0_4] : memref<1x128xf32, #tpu.memory_space<vmem>>, vector<1x128xf32>
    %3 = vector.shape_cast %2 : vector<1x128xf32> to vector<1x128xf32>
    %4 = vector.broadcast %3 : vector<1x128xf32> to vector<8x128xf32>
    %5 = vector.extract_strided_slice %0 {offsets = [0, 0], sizes = [8, 1], strides = [1, 1]} : vector<8x4xf32> to vector<8x1xf32>
    %6 = vector.extract_strided_slice %1 {offsets = [0, 0], sizes = [1, 128], strides = [1, 1]} : vector<4x128xf32> to vector<1x128xf32>
    %7 = vector.broadcast %5 : vector<8x1xf32> to vector<8x128xf32>
    %8 = vector.broadcast %6 : vector<1x128xf32> to vector<8x128xf32>
    %9 = arith.mulf %7, %8 : vector<8x128xf32>
    %10 = arith.addf %4, %9 : vector<8x128xf32>
    %11 = vector.extract_strided_slice %0 {offsets = [0, 1], sizes = [8, 1], strides = [1, 1]} : vector<8x4xf32> to vector<8x1xf32>
    %12 = vector.extract_strided_slice %1 {offsets = [1, 0], sizes = [1, 128], strides = [1, 1]} : vector<4x128xf32> to vector<1x128xf32>
    %13 = vector.broadcast %11 : vector<8x1xf32> to vector<8x128xf32>
    %14 = vector.broadcast %12 : vector<1x128xf32> to vector<8x128xf32>
    %15 = arith.mulf %13, %14 : vector<8x128xf32>
    %16 = arith.addf %10, %15 : vector<8x128xf32>
    %17 = vector.extract_strided_slice %0 {offsets = [0, 2], sizes = [8, 1], strides = [1, 1]} : vector<8x4xf32> to vector<8x1xf32>
    %18 = vector.extract_strided_slice %1 {offsets = [2, 0], sizes = [1, 128], strides = [1, 1]} : vector<4x128xf32> to vector<1x128xf32>
    %19 = vector.broadcast %17 : vector<8x1xf32> to vector<8x128xf32>
    %20 = vector.broadcast %18 : vector<1x128xf32> to vector<8x128xf32>
    %21 = arith.mulf %19, %20 : vector<8x128xf32>
    %22 = arith.addf %16, %21 : vector<8x128xf32>
    %23 = vector.extract_strided_slice %0 {offsets = [0, 3], sizes = [8, 1], strides = [1, 1]} : vector<8x4xf32> to vector<8x1xf32>
    %24 = vector.extract_strided_slice %1 {offsets = [3, 0], sizes = [1, 128], strides = [1, 1]} : vector<4x128xf32> to vector<1x128xf32>
    %25 = vector.broadcast %23 : vector<8x1xf32> to vector<8x128xf32>
    %26 = vector.broadcast %24 : vector<1x128xf32> to vector<8x128xf32>
    %27 = arith.mulf %25, %26 : vector<8x128xf32>
    %28 = arith.addf %22, %27 : vector<8x128xf32>
    %cst = arith.constant 0.000000e+00 : f32
    %29 = vector.broadcast %cst : f32 to vector<8x128xf32>
    %30 = arith.maximumf %28, %29 : vector<8x128xf32>
    %c0_5 = arith.constant 0 : index
    %c0_6 = arith.constant 0 : index
    %31 = vector.load %arg4[%c0_5, %c0_6] : memref<128x128xf32, #tpu.memory_space<vmem>>, vector<128x128xf32>
    %cst_7 = arith.constant dense<0.000000e+00> : vector<8x128xf32>
    %32 = tpu.matmul %30, %31, %cst_7 {dimension_numbers = #tpu.dot_dimension_numbers<[1], [0], [0], [1], [0, 0, 1, 1], [], []>} : vector<8x128xf32>, vector<128x128xf32>, vector<8x128xf32> -> vector<8x128xf32>
    %c0_8 = arith.constant 0 : index
    %c0_9 = arith.constant 0 : index
    %33 = vector.load %arg5[%c0_8, %c0_9] : memref<1x128xf32, #tpu.memory_space<vmem>>, vector<1x128xf32>
    %34 = vector.broadcast %33 : vector<1x128xf32> to vector<8x128xf32>
    %35 = arith.addf %32, %34 : vector<8x128xf32>
    %cst_10 = arith.constant 0.000000e+00 : f32
    %36 = vector.broadcast %cst_10 : f32 to vector<8x128xf32>
    %37 = arith.maximumf %35, %36 : vector<8x128xf32>
    %c0_11 = arith.constant 0 : index
    %c0_12 = arith.constant 0 : index
    %38 = vector.load %arg6[%c0_11, %c0_12] : memref<128x128xf32, #tpu.memory_space<vmem>>, vector<128x128xf32>
    %cst_13 = arith.constant dense<0.000000e+00> : vector<8x128xf32>
    %39 = tpu.matmul %37, %38, %cst_13 {dimension_numbers = #tpu.dot_dimension_numbers<[1], [0], [0], [1], [0, 0, 1, 1], [], []>} : vector<8x128xf32>, vector<128x128xf32>, vector<8x128xf32> -> vector<8x128xf32>
    %c0_14 = arith.constant 0 : index
    %c0_15 = arith.constant 0 : index
    %40 = vector.load %arg7[%c0_14, %c0_15] : memref<1x128xf32, #tpu.memory_space<vmem>>, vector<1x128xf32>
    %41 = vector.broadcast %40 : vector<1x128xf32> to vector<8x128xf32>
    %42 = arith.addf %39, %41 : vector<8x128xf32>
    %43 = arith.addf %42, %30 : vector<8x128xf32>
    %cst_16 = arith.constant 0.000000e+00 : f32
    %44 = vector.broadcast %cst_16 : f32 to vector<8x128xf32>
    %45 = arith.maximumf %43, %44 : vector<8x128xf32>
    %c0_17 = arith.constant 0 : index
    %c0_18 = arith.constant 0 : index
    %46 = vector.load %arg8[%c0_17, %c0_18] : memref<128x128xf32, #tpu.memory_space<vmem>>, vector<128x128xf32>
    %cst_19 = arith.constant dense<0.000000e+00> : vector<8x128xf32>
    %47 = tpu.matmul %45, %46, %cst_19 {dimension_numbers = #tpu.dot_dimension_numbers<[1], [0], [0], [1], [0, 0, 1, 1], [], []>} : vector<8x128xf32>, vector<128x128xf32>, vector<8x128xf32> -> vector<8x128xf32>
    %c0_20 = arith.constant 0 : index
    %c0_21 = arith.constant 0 : index
    %48 = vector.load %arg9[%c0_20, %c0_21] : memref<1x128xf32, #tpu.memory_space<vmem>>, vector<1x128xf32>
    %49 = vector.broadcast %48 : vector<1x128xf32> to vector<8x128xf32>
    %50 = arith.addf %47, %49 : vector<8x128xf32>
    %51 = vector.extract_strided_slice %50 {offsets = [0, 0], sizes = [8, 5], strides = [1, 1]} : vector<8x128xf32> to vector<8x5xf32>
    %c0_22 = arith.constant 0 : index
    %c0_23 = arith.constant 0 : index
    %52 = vector.load %arg10[%c0_22, %c0_23] : memref<8x5xf32, #tpu.memory_space<vmem>>, vector<8x5xf32>
    tpu.vector_store %arg10[%c0_22, %c0_23], %51 {strides = array<i32>} : memref<8x5xf32, #tpu.memory_space<vmem>>, vector<8x5xf32>,
    return
  }
  func.func @transform_0(%arg0: i32) -> (i32, i32) {
    %c0_i32 = arith.constant 0 : i32
    %c0_i32_0 = arith.constant 0 : i32
    return %arg0, %c0_i32 : i32, i32
  }
  func.func @transform_1(%arg0: i32) -> (i32, i32) {
    %c0_i32 = arith.constant 0 : i32
    %c0_i32_0 = arith.constant 0 : i32
    %c0_i32_1 = arith.constant 0 : i32
    return %c0_i32, %c0_i32_0 : i32, i32
  }
  func.func @transform_2(%arg0: i32) -> (i32, i32) {
    %c0_i32 = arith.constant 0 : i32
    %c0_i32_0 = arith.constant 0 : i32
    %c0_i32_1 = arith.constant 0 : i32
    return %c0_i32, %c0_i32_0 : i32, i32
  }
  func.func @transform_3(%arg0: i32) -> (i32, i32) {
    %c0_i32 = arith.constant 0 : i32
    %c0_i32_0 = arith.constant 0 : i32
    %c0_i32_1 = arith.constant 0 : i32
    return %c0_i32, %c0_i32_0 : i32, i32
  }
  func.func @transform_4(%arg0: i32) -> (i32, i32) {
    %c0_i32 = arith.constant 0 : i32
    %c0_i32_0 = arith.constant 0 : i32
    %c0_i32_1 = arith.constant 0 : i32
    return %c0_i32, %c0_i32_0 : i32, i32
  }
  func.func @transform_5(%arg0: i32) -> (i32, i32) {
    %c0_i32 = arith.constant 0 : i32
    %c0_i32_0 = arith.constant 0 : i32
    %c0_i32_1 = arith.constant 0 : i32
    return %c0_i32, %c0_i32_0 : i32, i32
  }
  func.func @transform_6(%arg0: i32) -> (i32, i32) {
    %c0_i32 = arith.constant 0 : i32
    %c0_i32_0 = arith.constant 0 : i32
    %c0_i32_1 = arith.constant 0 : i32
    return %c0_i32, %c0_i32_0 : i32, i32
  }
  func.func @transform_7(%arg0: i32) -> (i32, i32) {
    %c0_i32 = arith.constant 0 : i32
    %c0_i32_0 = arith.constant 0 : i32
    %c0_i32_1 = arith.constant 0 : i32
    return %c0_i32, %c0_i32_0 : i32, i32
  }
  func.func @transform_8(%arg0: i32) -> (i32, i32) {
    %c0_i32 = arith.constant 0 : i32
    %c0_i32_0 = arith.constant 0 : i32
    %c0_i32_1 = arith.constant 0 : i32
    return %c0_i32, %c0_i32_0 : i32, i32
  }
  func.func @transform_9(%arg0: i32) -> (i32, i32) {
    %c0_i32 = arith.constant 0 : i32
    %c0_i32_0 = arith.constant 0 : i32
    return %arg0, %c0_i32 : i32, i32
  }
}

</mosaic_0001>

<bundles_post_ra>
// kernel: tpu_custom_call.1
= control target key start
LH: loop header
LB: loop body
LE: loop exit
PB: predicated region body
PF: predicated region fallthrough
CT: control target
= control target key end

     0   :  { %14 = vsyncpa [#allocation3], 0  ;;  %s841_s0 = inlined_call_operand.vmem [shape: f32[8,4], index: 0, kind: input, shape index: {}]   ;;  %s842_s1 = inlined_call_operand.vmem [shape: f32[4,128], index: 1, kind: input, shape index: {}]   ;;  %s843_s2 = inlined_call_operand.vmem [shape: f32[1,128], index: 2, kind: input, shape index: {}]   ;;  %s844_s3 = inlined_call_operand.hbm [shape: f32[128,128], index: 3, kind: input, shape index: {}]   ;;  %s845_s4 = inlined_call_operand.vmem [shape: f32[1,128], index: 4, kind: input, shape index: {}]   ;;  %s846_s5 = inlined_call_operand.hbm [shape: f32[128,128], index: 5, kind: input, shape index: {}]   ;;  %s847_s6 = inlined_call_operand.vmem [shape: f32[1,128], index: 6, kind: input, shape index: {}]   ;;  %s848_s7 = inlined_call_operand.hbm [shape: f32[128,128], index: 7, kind: input, shape index: {}]   ;;  %s849_s8 = inlined_call_operand.vmem [shape: f32[1,128], index: 8, kind: input, shape index: {}]   ;;  %s850_s9 = inlined_call_operand.hbm [shape: f32[8,5], index: 9, kind: output, shape index: {}]  }
   0x1   :  { %15 = vsyncpa [#allocation6], 0 }
   0x2   :  { %16 = vsyncpa [#allocation4], 0  ;;  %s688_s30 = smov [#allocation5]   ;;  %s689_s11 = smov [#allocation2]  }
   0x3   :  { %s42_s10 = sshll.u32 %s688_s30, 4  ;;  %s28_s12 = sshll.u32 %s689_s11, 4  ;;  %s43_s10 = int_to_ptr.vmem [resolvable:$true] %s42_s10  ;;  %s29_s12 = int_to_ptr.vmem [resolvable:$true] %s28_s12 }
   0x4   :  { %s610_s13 = scalar_lea.vmem %s43_s10, 2048  ;;  %p615_p1 = scmp.lt.s32.totalorder %s43_s10, %s43_s10 }
   0x5   :  { %p611_p0 = scmp.ne.s32.totalorder %s43_s10, %s610_s13  ;;  %p616_p2 = scmp.lt.s32.totalorder %s610_s13, %s610_s13 }
   0x7   :  { %p617_p3 = por %p616_p2, %p615_p1 }
   0x9   :  { %p618_p4 = pnand %p617_p3, %p611_p0 }
   0xb   :  { %621 = shalt.err (!%p618_p4)
}
   0xc   :  { %s690_s14 = smov 128   ;;  %s691_s15 = smov 8  }
   0xd   :  { %48 = dma.hbm_to_vmem [thread:$0]  %s846_s5, 2048, %s43_s10, [#allocation6], %s690_s14, %s690_s14, %s691_s15  }
   0xe   :  { %s630_s18 = scalar_lea.vmem %s29_s12, 2048  ;;  %p635_p6 = scmp.lt.s32.totalorder %s29_s12, %s29_s12 }
   0xf   :  { %p631_p5 = scmp.ne.s32.totalorder %s29_s12, %s630_s18  ;;  %p636_p7 = scmp.lt.s32.totalorder %s630_s18, %s630_s18 }
  0x11   :  { %p637_p8 = por %p636_p7, %p635_p6 }
  0x13   :  { %p638_p9 = pnand %p637_p8, %p631_p5 }
  0x15   :  { %641 = shalt.err (!%p638_p9)
}
  0x16   :  { %34 = dma.hbm_to_vmem [thread:$0]  %s844_s3, 2048, %s29_s12, [#allocation3], %s690_s14, %s690_s14, %s691_s15  }
  0x17   :  { %s692_s21 = smov [#allocation7]  }
  0x18   :  { %s56_s22 = sshll.u32 %s692_s21, 4  ;;  %s57_s22 = int_to_ptr.vmem [resolvable:$true] %s56_s22 }
  0x19   :  { %s650_s23 = scalar_lea.vmem %s57_s22, 2048  ;;  %p655_p11 = scmp.lt.s32.totalorder %s57_s22, %s57_s22 }
  0x1a   :  { %p651_p10 = scmp.ne.s32.totalorder %s57_s22, %s650_s23  ;;  %p656_p12 = scmp.lt.s32.totalorder %s650_s23, %s650_s23 }
  0x1c   :  { %p657_p13 = por %p656_p12, %p655_p11 }
  0x1e   :  { %p658_p0 = pnand %p657_p13, %p651_p10 }
  0x20   :  { %661 = shalt.err (!%p658_p0)
}
  0x21   :  { %62 = dma.hbm_to_vmem [thread:$0]  %s848_s7, 2048, %s57_s22, [#allocation6], %s690_s14, %s690_s14, %s691_s15  }
  0x22   :  { %682 = dma.done.wait [#allocation3], 2048  }
  0x23   :  { %683 = vsyncadd [#allocation3], 4294965248 }
  0x24   :  { %684 = dma.done.wait [#allocation6], 4096  }
  0x25   :  { %685 = vsyncadd [#allocation6], 4294963200  ;;  %v693_v0 = vmov 0   ;;  %v694_v1 = vmov 2   ;;  %v695_v2 = vmov 0.0   ;;  %v74_v3 = vld [vmem:[%s841_s0] sm:$0xff]  ;;  %v88_v35 = vlaneseq }
  0x26   :  { %597 = vset.pattern.permute.xlu0 %v693_v0  ;;  %599 = vset.pattern.permute.xlu1 %v694_v1  ;;  %v140_v4 = vld [vmem:[#allocation2 + $0x78] sm:$0xff]  ;;  %v139_v5 = vld [vmem:[#allocation2 + $0x70] sm:$0xff]  ;;  %v696_v6 = vmov 1   ;;  %v697_v7 = vmov 3   ;;  %v138_v8 = vld [vmem:[#allocation2 + $0x68] sm:$0xff]  ;;  %vm698_vm0 = vmmov 0  }
  0x27   :  { %480 = vmatprep.subr.mxu0 %v695_v2  ;;  %515 = vmatprep.subr.mxu1 %v695_v2  ;;  %v137_v9 = vld [vmem:[#allocation2 + $0x60] sm:$0xff]  ;;  %v136_v10 = vld [vmem:[#allocation2 + $0x58] sm:$0xff]  ;;  %v135_v11 = vld [vmem:[#allocation2 + $0x50] sm:$0xff]  ;;  %v89_v36 = vshrl.u32 %v88_v35, 7  ;;  %s699_s10 = smov [#allocation8]   ;;  %vm407_vm1 = vcmask 39936  }
  0x28   :  { %85 = vperm.xlu0 %597, %v74_v3   ;;  %105 = vperm.xlu1 %599, %v74_v3   ;;  %v234_v12 = vld [vmem:[#allocation5 + $0x78] sm:$0xff]  ;;  %v233_v13 = vld [vmem:[#allocation5 + $0x70] sm:$0xff]  ;;  %v134_v14 = vld [vmem:[#allocation2 + $0x48] sm:$0xff]  ;;  %s415_s11 = sshll.u32 %s699_s10, 4  ;;  %s416_s11 = int_to_ptr.vmem [resolvable:$true] %s415_s11 }
  0x29   :  { %481 = vmatpush3.msra.mxu0 %v140_v4  ;;  %512 = vmatprep.mubr.msk.f32.mxu0 %vm698_vm0, %v695_v2  ;;  %v232_v15 = vld [vmem:[#allocation5 + $0x68] sm:$0xff]  ;;  %v133_v16 = vld [vmem:[#allocation2 + $0x40] sm:$0xff]  ;;  %v132_v18 = vld [vmem:[#allocation2 + $0x38] sm:$0xff]  ;;  %v90_v37 = vsub.s32 0, %v89_v36  ;;  %v100_v40 = vsub.s32 1, %v89_v36  ;;  %v110_v42 = vsub.s32 2, %v89_v36  ;;  %p667_p2 = scmp.lt.s32.totalorder %s416_s11, %s416_s11 }
  0x2a   :  { %482 = vmatprep.subr.mxu0 %v695_v2  ;;  %547 = vmatprep.mubr.msk.f32.mxu1 %vm698_vm0, %v695_v2  ;;  %v231_v17 = vld [vmem:[#allocation5 + $0x60] sm:$0xff]  ;;  %v230_v19 = vld [vmem:[#allocation5 + $0x58] sm:$0xff]  ;;  %v131_v20 = vld [vmem:[#allocation2 + $0x30] sm:$0xff]  ;;  %v120_v44 = vsub.s32 3, %v89_v36 }
  0x2b   :  { %483 = vmatpush3.msra.mxu0 %v139_v5  ;;  %516 = vmatpush3.msra.mxu1 %v234_v12  ;;  %v229_v21 = vld [vmem:[#allocation5 + $0x50] sm:$0xff]  ;;  %v130_v22 = vld [vmem:[#allocation2 + $0x28] sm:$0xff]  ;;  %v129_v24 = vld [vmem:[#allocation2 + $0x20] sm:$0xff] }
  0x2c   :  { %598 = vset.pattern.permute.xlu0 %v696_v6  ;;  %600 = vset.pattern.permute.xlu1 %v697_v7  ;;  %v228_v23 = vld [vmem:[#allocation5 + $0x48] sm:$0xff]  ;;  %v227_v25 = vld [vmem:[#allocation5 + $0x40] sm:$0xff]  ;;  %v128_v26 = vld [vmem:[#allocation2 + $0x18] sm:$0xff] }
  0x2d   :  { %95 = vperm.xlu0 %598, %v74_v3   ;;  %115 = vperm.xlu1 %600, %v74_v3   ;;  %v226_v27 = vld [vmem:[#allocation5 + $0x38] sm:$0xff]  ;;  %v127_v28 = vld [vmem:[#allocation2 + $0x10] sm:$0xff]  ;;  %v126_v30 = vld [vmem:[#allocation2 + $0x8] sm:$0xff] }
  0x2e   :  { %484 = vmatprep.subr.mxu0 %v695_v2  ;;  %517 = vmatprep.subr.mxu1 %v695_v2  ;;  %v225_v29 = vld [vmem:[#allocation5 + $0x30] sm:$0xff]  ;;  %v224_v31 = vld [vmem:[#allocation5 + $0x28] sm:$0xff]  ;;  %v125_v32 = vld [vmem:[#allocation2] sm:$0xff] }
  0x2f   :  { %485 = vmatpush3.msra.mxu0 %v138_v8  ;;  %518 = vmatpush3.msra.mxu1 %v233_v13  ;;  %v223_v33 = vld [vmem:[#allocation5 + $0x20] sm:$0xff]  ;;  %v222_v34 = vld [vmem:[#allocation5 + $0x18] sm:$0xff]  ;;  %v221_v60 = vld [vmem:[#allocation5 + $0x10] sm:$0xff] }
  0x30   :  { %486 = vmatprep.subr.mxu0 %v695_v2  ;;  %519 = vmatprep.subr.mxu1 %v695_v2  ;;  %v75_v38 = vld [vmem:[%s842_s1] sm:$0xf]  ;;  %v220_v61 = vld [vmem:[#allocation5 + $0x8] sm:$0xff]  ;;  %v329_v63 = vld [vmem:[#allocation7 + $0x78] sm:$0xff] }
  0x31   :  { %487 = vmatpush3.msra.mxu0 %v137_v9  ;;  %601 = vset.pattern.permute.xlu0 %v697_v7  ;;  %v91_v39 = vrot.slane %v75_v38, %v90_v37  ;;  %v101_v46 = vrot.slane %v75_v38, %v100_v40  ;;  %v425_v47 = vld [vmem:[%s843_s2] ss:$0 sm:$0xff]  ;;  %v111_v48 = vrot.slane %v75_v38, %v110_v42  ;;  %v328_v0 = vld [vmem:[#allocation7 + $0x70] sm:$0xff]  ;;  %v327_v1 = vld [vmem:[#allocation7 + $0x68] sm:$0xff] }
  0x32   :  { %488 = vmatprep.subr.mxu0 %v695_v2  ;;  %520 = vmatpush3.msra.mxu1 %v232_v15  ;;  %v121_v49 = vrot.slane %v75_v38, %v120_v44  ;;  %v219_v62 = vld [vmem:[#allocation5] sm:$0xff]  ;;  %v325_v4 = vld [vmem:[#allocation7 + $0x58] sm:$0xff]  ;;  %v324_v5 = vld [vmem:[#allocation7 + $0x50] sm:$0xff] }
  0x33   :  { %489 = vmatpush3.msra.mxu0 %v136_v10  ;;  %521 = vmatprep.subr.mxu1 %v695_v2  ;;  %v326_v3 = vld [vmem:[#allocation7 + $0x60] sm:$0xff]  ;;  %v323_v6 = vld [vmem:[#allocation7 + $0x48] sm:$0xff]  ;;  %v321_v8 = vld [vmem:[#allocation7 + $0x38] sm:$0xff] }
  0x34   :  { %490 = vmatprep.subr.mxu0 %v695_v2  ;;  %522 = vmatpush3.msra.mxu1 %v231_v17  ;;  %v322_v7 = vld [vmem:[#allocation7 + $0x40] sm:$0xff]  ;;  %v320_v9 = vld [vmem:[#allocation7 + $0x30] sm:$0xff]  ;;  %v319_v10 = vld [vmem:[#allocation7 + $0x28] sm:$0xff] }
  0x35   :  { %491 = vmatpush3.msra.mxu0 %v135_v11  ;;  %523 = vmatprep.subr.mxu1 %v695_v2  ;;  %v318_v11 = vld [vmem:[#allocation7 + $0x20] sm:$0xff]  ;;  %v317_v17 = vld [vmem:[#allocation7 + $0x18] sm:$0xff] }
  0x36   :  { %492 = vmatprep.subr.mxu0 %v695_v2  ;;  %524 = vmatpush3.msra.mxu1 %v230_v19  ;;  %v426_v12 = vld [vmem:[%s845_s4] ss:$0 sm:$0xff]  ;;  %v315_v19 = vld [vmem:[#allocation7 + $0x8] sm:$0xff] }
  0x37   :  { %493 = vmatpush3.msra.mxu0 %v134_v14  ;;  %525 = vmatprep.subr.mxu1 %v695_v2 }
  0x38   :  { %494 = vmatprep.subr.mxu0 %v695_v2  ;;  %526 = vmatpush3.msra.mxu1 %v229_v21  ;;  %v427_v21 = vld [vmem:[%s847_s6] ss:$0 sm:$0xff]  ;;  %s662_s6 = scalar_lea.vmem %s416_s11, 128 }
  0x39   :  { %495 = vmatpush3.msra.mxu0 %v133_v16  ;;  %527 = vmatprep.subr.mxu1 %v695_v2  ;;  %p663_p1 = scmp.ne.s32.totalorder %s416_s11, %s662_s6  ;;  %p668_p3 = scmp.lt.s32.totalorder %s662_s6, %s662_s6 }
  0x3a   :  { %496 = vmatprep.subr.mxu0 %v695_v2  ;;  %528 = vmatpush3.msra.mxu1 %v228_v23 }
  0x3b   :  { %497 = vmatpush3.msra.mxu0 %v132_v18  ;;  %529 = vmatprep.subr.mxu1 %v695_v2  ;;  %v316_v18 = vld [vmem:[#allocation7 + $0x10] sm:$0xff]  ;;  %p669_p4 = por %p668_p3, %p667_p2 }
  0x3c   :  { %498 = vmatprep.subr.mxu0 %v695_v2  ;;  %530 = vmatpush3.msra.mxu1 %v227_v25 }
  0x3d   :  { %499 = vmatpush3.msra.mxu0 %v131_v20  ;;  %531 = vmatprep.subr.mxu1 %v695_v2  ;;  %v314_v20 = vld [vmem:[#allocation7] sm:$0xff]  ;;  %p670_p5 = pnand %p669_p4, %p663_p1 }
  0x3e   :  { %500 = vmatprep.subr.mxu0 %v695_v2  ;;  %532 = vmatpush3.msra.mxu1 %v226_v27  ;;  %v428_v27 = vld [vmem:[%s849_s8] ss:$0 sm:$0xff] }
  0x3f   :  { %501 = vmatpush3.msra.mxu0 %v130_v22  ;;  %533 = vmatprep.subr.mxu1 %v695_v2 }
  0x40   :  { %502 = vmatprep.subr.mxu0 %v695_v2  ;;  %534 = vmatpush3.msra.mxu1 %v225_v29 }
  0x41   :  { %503 = vmatpush3.msra.mxu0 %v129_v24  ;;  %535 = vmatprep.subr.mxu1 %v695_v2 }
  0x42   :  { %504 = vmatprep.subr.mxu0 %v695_v2  ;;  %536 = vmatpush3.msra.mxu1 %v224_v31 }
  0x43   :  { %505 = vmatpush3.msra.mxu0 %v128_v26  ;;  %537 = vmatprep.subr.mxu1 %v695_v2 }
  0x44   :  { %506 = vmatprep.subr.mxu0 %v695_v2  ;;  %538 = vmatpush3.msra.mxu1 %v223_v33 }
  0x45   :  { %507 = vmatpush3.msra.mxu0 %v127_v28  ;;  %539 = vmatprep.subr.mxu1 %v695_v2 }
  0x46   :  { %508 = vmatprep.subr.mxu0 %v695_v2  ;;  %540 = vmatpush3.msra.mxu1 %v222_v34 }
  0x47   :  { %509 = vmatpush3.msra.mxu0 %v126_v30  ;;  %541 = vmatprep.subr.mxu1 %v695_v2 }
  0x48   :  { %510 = vmatprep.subr.mxu0 %v695_v2  ;;  %542 = vmatpush3.msra.mxu1 %v221_v60 }
  0x49   :  { %511 = vmatpush3.msra.mxu0 %v125_v32  ;;  %543 = vmatprep.subr.mxu1 %v695_v2 }
  0x4a   :  { %550 = vmatprep.subr.mxu0 %v695_v2  ;;  %544 = vmatpush3.msra.mxu1 %v220_v61 }
  0x4b   :  { %545 = vmatprep.subr.mxu1 %v695_v2 }
  0x4c   :  { %546 = vmatpush3.msra.mxu1 %v219_v62 }
  0xa3   :  { %v86_v41 = vpop.permute.xlu0 %85  ;;  %v106_v43 = vpop.permute.xlu1 %105 }
  0xa4   :  { %v92_v45 = vmul.f32 %v91_v39, %v86_v41  ;;  %v112_v54 = vmul.f32 %v111_v48, %v106_v43 }
  0xa6   :  { %v93_v52 = vadd.f32 %v425_v47, %v92_v45 }
  0xa8   :  { %v96_v50 = vpop.permute.xlu0 %95  ;;  %v116_v51 = vpop.permute.xlu1 %115 }
  0xa9   :  { %v102_v53 = vmul.f32 %v101_v46, %v96_v50  ;;  %v122_v56 = vmul.f32 %v121_v49, %v116_v51 }
  0xab   :  { %v103_v55 = vadd.f32 %v102_v53, %v93_v52 }
  0xad   :  { %v113_v57 = vadd.f32 %v112_v54, %v103_v55 }
  0xaf   :  { %v803_v58 = vadd.f32 %v122_v56, %v113_v57 }
  0xb1   :  { %v124_v59 = vmax.f32 %v803_v58, 0.0 }
  0xb3   :  { %513 = vmatmul.mubr.f32.vlgmr.msra.gmra.mxu0 %v124_v59 }
  0xb4   :  { %582 = vmatprep.mubr.msk.f32.mxu0 %vm698_vm0, %v695_v2  ;;  %551 = vmatpush3.msra.mxu0 %v329_v63 }
  0xb5   :  { %552 = vmatprep.subr.mxu0 %v695_v2 }
  0xb6   :  { %553 = vmatpush3.msra.mxu0 %v328_v0 }
  0xb7   :  { %554 = vmatprep.subr.mxu0 %v695_v2 }
  0xb8   :  { %555 = vmatpush3.msra.mxu0 %v327_v1 }
  0xb9   :  { %556 = vmatprep.subr.mxu0 %v695_v2 }
  0xba   :  { %557 = vmatpush3.msra.mxu0 %v326_v3 }
  0xbb   :  { %558 = vmatprep.subr.mxu0 %v695_v2 }
  0xbc   :  { %559 = vmatpush3.msra.mxu0 %v325_v4 }
  0xbd   :  { %560 = vmatprep.subr.mxu0 %v695_v2 }
  0xbe   :  { %561 = vmatpush3.msra.mxu0 %v324_v5 }
  0xbf   :  { %562 = vmatprep.subr.mxu0 %v695_v2 }
  0xc0   :  { %563 = vmatpush3.msra.mxu0 %v323_v6 }
  0xc1   :  { %564 = vmatprep.subr.mxu0 %v695_v2 }
  0xc2   :  { %565 = vmatpush3.msra.mxu0 %v322_v7 }
  0xc3   :  { %566 = vmatprep.subr.mxu0 %v695_v2 }
  0xc4   :  { %567 = vmatpush3.msra.mxu0 %v321_v8 }
  0xc5   :  { %568 = vmatprep.subr.mxu0 %v695_v2 }
  0xc6   :  { %569 = vmatpush3.msra.mxu0 %v320_v9 }
  0xc7   :  { %570 = vmatprep.subr.mxu0 %v695_v2 }
  0xc8   :  { %571 = vmatpush3.msra.mxu0 %v319_v10 }
  0xc9   :  { %572 = vmatprep.subr.mxu0 %v695_v2 }
  0xca   :  { %573 = vmatpush3.msra.mxu0 %v318_v11 }
  0xcb   :  { %574 = vmatprep.subr.mxu0 %v695_v2 }
  0xcc   :  { %575 = vmatpush3.msra.mxu0 %v317_v17 }
  0xcd   :  { %576 = vmatprep.subr.mxu0 %v695_v2 }
  0xce   :  { %577 = vmatpush3.msra.mxu0 %v316_v18 }
  0xcf   :  { %578 = vmatprep.subr.mxu0 %v695_v2 }
  0xd0   :  { %579 = vmatpush3.msra.mxu0 %v315_v19 }
  0xd1   :  { %580 = vmatprep.subr.mxu0 %v695_v2 }
  0xd2   :  { %581 = vmatpush3.msra.mxu0 %v314_v20 }
 0x173   :  { %v214_v13 = vpop.f32.mrf.mxu0 }
 0x174   :  { %v215_v14 = vadd.f32 %v426_v12, %v214_v13 }
 0x175   :  { %v514_v15 = vpop.f32.mrf.mxu0 }
 0x176   :  { %v218_v16 = vmax.f32 %v215_v14, 0.0 }
 0x178   :  { %548 = vmatmul.mubr.f32.vlgmr.msra.gmra.mxu1 %v218_v16 }
 0x238   :  { %v308_v22 = vpop.f32.mrf.mxu1 }
 0x239   :  { %v309_v23 = vadd.f32 %v427_v21, %v308_v22 }
 0x23a   :  { %v549_v24 = vpop.f32.mrf.mxu1 }
 0x23b   :  { %v312_v25 = vadd.f32 %v309_v23, %v124_v59 }
 0x23d   :  { %v313_v26 = vmax.f32 %v312_v25, 0.0 }
 0x23f   :  { %583 = vmatmul.mubr.f32.vlgmr.msra.gmra.mxu0 %v313_v26 }
 0x2ff   :  { %v403_v2 = vpop.f32.mrf.mxu0 }
 0x300   :  { %v404_v28 = vadd.f32 %v428_v27, %v403_v2 }
 0x301   :  { %v584_v29 = vpop.f32.mrf.mxu0 }
 0x302   :  { %408 = vst.msk [vmem:[#allocation8] sm:$0xff] %vm407_vm1, %v404_v28 }
 0x303   :  { %673 = shalt.err (!%p670_p5)
}
 0x304   :  { %418 = dma.vmem_to_hbm [thread:$0]  %s416_s11, 128, %s850_s9, [#allocation4]  }
 0x305   :  { %686 = dma.done.wait [#allocation4], 128  }
 0x306   :  { %687 = vsyncadd [#allocation4], 4294967168 }
 0x307   :  { %422 = vsyncpa [#allocation3], 1 }
 0x308   :  { %423 = vsyncpa [#allocation6], 1 }
 0x309   :  { %424 = vsyncpa [#allocation4], 1 }

</bundles_post_ra>
